<compile_context>
chip_gen: v6e
topology: v6e:2x2x1
jax: 0.10.0
libtpu: 0.0.40
codegen_flags: <defaults>
</compile_context>

<pallas_src>
import math

import jax
import jax.numpy as jnp
from jax import lax
from jax.experimental import pallas as pl
from jax.experimental.pallas import tpu as pltpu


# ---------------------------------------------------------------------------
# helpers
# ---------------------------------------------------------------------------
def _round_up(x: int, m: int) -> int:
    return ((x + m - 1) // m) * m


def _ceil_div(a: int, b: int) -> int:
    return -(-a // b)


# Conservative budgets so one tiling works on every generation
# (v7x: 64 MiB physical VMEM per TensorCore vs 128 MiB on v5e/v6e).
_VMEM_BUDGET = 40 << 20
_VMEM_LIMIT_CAP = 48 << 20


def _choose_tiling(n: int, cap: int, lane_align: int):
    """Pick (rows_per_block, num_blocks, n_pad), minimizing tail padding."""
    if n <= cap:
        rows = _round_up(max(n, 8), 8)          # single block == full array
        return rows, 1, rows
    nb = _ceil_div(n, cap)
    rows = _round_up(_ceil_div(n, nb), lane_align)
    nb = _ceil_div(n, rows)
    return rows, nb, rows * nb


# ---------------------------------------------------------------------------
# Path 1: small vocabulary -> one-hot matmul, table resident in VMEM
# ---------------------------------------------------------------------------
def _matmul_vmem_bytes(rows, num_feat, hidden, itemsize):
    table = num_feat * hidden * itemsize            # resident, single-buffered
    idx = rows * 4 * 2                              # lane-dense index tiles (x2 buffers)
    out = rows * hidden * itemsize * 2              # output tiles (x2 buffers)
    tmp = rows * num_feat * (4 + 2 * itemsize)      # iota + one-hot + its transpose
    acc = rows * hidden * 4                         # f32 matmul result
    return table + idx + out + tmp + acc


def _make_onehot_kernel(rows_per_block: int, num_feat: int):
    def kernel(idx_ref, table_ref, out_ref):
        # idx_ref   : VMEM (1, rows_per_block) int32  — this step's indices (lane-dense)
        # table_ref : VMEM (num_feat, hidden)          — whole table, resident
        # out_ref   : VMEM (rows_per_block, hidden)
        idx = idx_ref[...]                                              # (1, rows)
        feat = lax.broadcasted_iota(
            jnp.int32, (num_feat, rows_per_block), 0)                   # (nf, rows)
        # Build the one-hot with rows on the lane axis (no cross-lane relayout
        # of the indices), then transpose on the otherwise-idle XLU so the MXU
        # sees a plain (rows, nf) @ (nf, hidden) matmul.  Out-of-range indices
        # produce an all-zero row instead of an OOB read.
        onehot_t = (feat == idx).astype(table_ref.dtype)                # (nf, rows)
        onehot = onehot_t.T                                             # (rows, nf)
        out_ref[...] = jnp.dot(
            onehot, table_ref[...],
            preferred_element_type=jnp.float32).astype(out_ref.dtype)
    return kernel


def _embedding_onehot_matmul(flat_idx, table, rows, num_blocks, n_pad):
    num_feat, hidden = table.shape
    itemsize = jnp.dtype(table.dtype).itemsize
    est = _matmul_vmem_bytes(rows, num_feat, hidden, itemsize)
    vmem_limit = int(min(max(2 * est, 16 << 20), _VMEM_LIMIT_CAP))
    cost = pl.CostEstimate(
        flops=int(2 * n_pad * num_feat * hidden),
        transcendentals=0,
        bytes_accessed=int(n_pad * 4
                           + num_feat * hidden * itemsize
                           + n_pad * hidden * itemsize),
    )
    idx2d = flat_idx.reshape(1, n_pad)      # lane-dense index stream

    def call(single_buffer_table: bool):
        if single_buffer_table:
            # Constant index_map -> nothing to pipeline; keep one VMEM copy of
            # the table instead of the default double buffer.
            table_spec = pl.BlockSpec((num_feat, hidden), lambda i: (0, 0),
                                      pipeline_mode=pl.Buffered(1))
        else:
            table_spec = pl.BlockSpec((num_feat, hidden), lambda i: (0, 0))
        return pl.pallas_call(
            _make_onehot_kernel(rows, num_feat),
            out_shape=jax.ShapeDtypeStruct((n_pad, hidden), table.dtype),
            grid_spec=pltpu.PrefetchScalarGridSpec(
                num_scalar_prefetch=0,
                grid=(num_blocks,),
                in_specs=[
                    # Lane-dense (1, rows) index tiles: ~4 B/row of HBM traffic.
                    pl.BlockSpec((1, rows), lambda i: (0, i)),
                    table_spec,
                ],
                out_specs=pl.BlockSpec((rows, hidden), lambda i: (i, 0)),
            ),
            compiler_params=pltpu.CompilerParams(
                dimension_semantics=("parallel",),   # disjoint output tiles
                vmem_limit_bytes=vmem_limit,
            ),
            cost_estimate=cost,
        )(idx2d, table)

    try:
        return call(True)
    except Exception:          # conservative fallback if Buffered(1) is rejected
        return call(False)


# ---------------------------------------------------------------------------
# Path 2: large vocabulary -> HBM table + per-row DMA gather
# ---------------------------------------------------------------------------
def _make_gather_kernel(rows_per_block: int, num_feat: int, n_inflight: int):
    def kernel(idx_ref, table_ref, out_ref, sems):
        # idx_ref   : SMEM (n_pad,) int32       — scalar-prefetched flat indices
        # table_ref : HBM  (num_feat, hidden)   — memory_space=pl.ANY
        # out_ref   : VMEM (rows_per_block, hidden)
        # sems      : DMA semaphores (n_inflight,)
        base = pl.program_id(0) * rows_per_block

        def row_copy(r):
            # Clamp so a bad index can never issue an out-of-bounds DMA.
            idx = jnp.clip(idx_ref[base + r], 0, num_feat - 1)
            return pltpu.make_async_copy(
                table_ref.at[pl.ds(idx, 1), :],
                out_ref.at[pl.ds(r, 1), :],
                sems.at[r % n_inflight])

        # Prime the pipeline with n_inflight outstanding row DMAs ...
        @pl.loop(0, n_inflight)
        def _prime(r):
            row_copy(r).start()

        # ... then wait/refill so n_inflight row copies stay in flight.
        @pl.loop(0, rows_per_block)
        def _drain(r):
            row_copy(r).wait()

            @pl.when(r + n_inflight < rows_per_block)
            def _():
                row_copy(r + n_inflight).start()

    return kernel


def _embedding_dma_gather(flat_idx, table, rows, num_blocks, n_pad):
    num_feat, hidden = table.shape
    itemsize = jnp.dtype(table.dtype).itemsize
    n_inflight = min(8, rows)
    est = rows * hidden * itemsize * 2 + (1 << 20)
    vmem_limit = int(min(max(2 * est, 16 << 20), _VMEM_LIMIT_CAP))
    cost = pl.CostEstimate(
        flops=0, transcendentals=0,
        bytes_accessed=int(n_pad * 4 + 2 * n_pad * hidden * itemsize),
    )
    # TODO(synk): for very large token counts (n >~ 128K) chunk the call or
    #             stream index tiles; the scalar-prefetched indices live
    #             entirely in SMEM.
    return pl.pallas_call(
        _make_gather_kernel(rows, num_feat, n_inflight),
        out_shape=jax.ShapeDtypeStruct((n_pad, hidden), table.dtype),
        grid_spec=pltpu.PrefetchScalarGridSpec(
            num_scalar_prefetch=1,                       # flat indices -> SMEM
            grid=(num_blocks,),
            in_specs=[pl.BlockSpec(memory_space=pl.ANY)],  # table stays in HBM
            out_specs=pl.BlockSpec((rows, hidden), lambda i, idx_ref: (i, 0)),
            scratch_shapes=[pltpu.SemaphoreType.DMA((n_inflight,))],
        ),
        compiler_params=pltpu.CompilerParams(
            dimension_semantics=("parallel",),
            vmem_limit_bytes=vmem_limit,
        ),
        cost_estimate=cost,
    )(flat_idx, table)


# ---------------------------------------------------------------------------
# Public forward
# ---------------------------------------------------------------------------
def embedding_forward(x, table, *, max_rows_per_block: int = 2048,
                      matmul_vocab_limit: int = 512, force_gather: bool = False):
    """Pallas nn.Embedding forward: returns table[x] with shape (*x.shape, hidden)."""
    num_feat, hidden_dim = table.shape
    itemsize = jnp.dtype(table.dtype).itemsize
    orig_shape = x.shape
    flat_idx = x.reshape(-1).astype(jnp.int32)
    n = int(flat_idx.shape[0])

    table_bytes = num_feat * hidden_dim * itemsize
    # One-hot matmul flips from HBM-bound to MXU-bound above a few hundred
    # features (earlier on v5e, and halve thresholds on v7x if tuning there),
    # and the table must comfortably fit VMEM next to the working tiles.
    use_gather = (force_gather
                  or num_feat > matmul_vocab_limit
                  or table_bytes > (8 << 20))

    if use_gather:
        cap = 1024
        while cap > 8 and cap * hidden_dim * itemsize * 2 > _VMEM_BUDGET:
            cap //= 2
        rows, num_blocks, n_pad = _choose_tiling(n, cap, 8)
        if n_pad != n:
            flat_idx = jnp.pad(flat_idx, (0, n_pad - n))
        out = _embedding_dma_gather(flat_idx, table, rows, num_blocks, n_pad)
    else:
        cap = max(128, _round_up(min(max_rows_per_block, 1 << 15), 128))
        while cap > 128 and _matmul_vmem_bytes(
                cap, num_feat, hidden_dim, itemsize) > _VMEM_BUDGET:
            cap //= 2
        rows, num_blocks, n_pad = _choose_tiling(n, cap, 128)
        if n_pad != n:
            flat_idx = jnp.pad(flat_idx, (0, n_pad - n))
        out = _embedding_onehot_matmul(flat_idx, table, rows, num_blocks, n_pad)

    if n_pad != n:
        out = out[:n]
    return out.reshape(*orig_shape, hidden_dim)


def make_embedding_table(key, num_feat, hidden_dim, dtype=jnp.float32):
    """Xavier-uniform init matching nn.init.xavier_uniform_ on (num_feat, hidden)."""
    bound = math.sqrt(6.0 / (num_feat + hidden_dim))
    return jax.random.uniform(key, (num_feat, hidden_dim), dtype=dtype,
                              minval=-bound, maxval=bound)


if __name__ == "__main__":
    key = jax.random.PRNGKey(0)
    k_tab, k_idx = jax.random.split(key)

    num_feat, hidden_dim = 64, 128
    batch, seq = 2, 8

    table = make_embedding_table(k_tab, num_feat, hidden_dim)
    x = jax.random.randint(k_idx, (batch, seq), minval=0, maxval=num_feat,
                           dtype=jnp.int32)
    ref = jnp.take(table, x, axis=0)

    # Path 1: small vocab -> one-hot MXU matmul with the table resident in VMEM.
    emb = jax.block_until_ready(embedding_forward(x, table))
    assert emb.shape == (batch, seq, hidden_dim)
    assert jnp.allclose(emb, ref, atol=1e-6), "one-hot matmul path mismatch"

    # Path 2: large vocab -> HBM table + per-row DMA gather (forced here so the
    # path is exercised at small shapes too; it is an exact row copy).
    emb_g = jax.block_until_ready(embedding_forward(x, table, force_gather=True))
    assert emb_g.shape == (batch, seq, hidden_dim)
    assert jnp.array_equal(emb_g, ref), "DMA gather path mismatch"

    print("KERNEL_OK")
</pallas_src>

<mosaic_0001>
module attributes {stable_mosaic.version = 11 : i64} {
  func.func @kernel(%arg0: i32, %arg1: memref<1x16xi32, #tpu.memory_space<vmem>>, %arg2: memref<64x128xf32, #tpu.memory_space<vmem>>, %arg3: memref<16x128xf32, #tpu.memory_space<vmem>>) attributes {dimension_semantics = [#tpu.dimension_semantics<parallel>], iteration_bounds = array<i64: 1>, scalar_prefetch = 0 : i64, scratch_operands = 0 : i64, tpu.core_type = #tpu.core_type<tc>, window_params = [{transform_indices = @transform_0, window_bounds = array<i64: 1, 16>}, {pipeline_mode = #tpu.pipeline_mode<synchronous>, transform_indices = @transform_1, window_bounds = array<i64: 64, 128>}, {transform_indices = @transform_2, window_bounds = array<i64: 16, 128>}]} {
    %c0 = arith.constant 0 : index
    %c0_0 = arith.constant 0 : index
    %0 = vector.load %arg1[%c0, %c0_0] : memref<1x16xi32, #tpu.memory_space<vmem>>, vector<1x16xi32>
    %1 = tpu.iota {dimensions = array<i32: 0>} : vector<64x16xi32>
    %2 = vector.broadcast %0 : vector<1x16xi32> to vector<64x16xi32>
    %3 = arith.cmpi eq, %1, %2 : vector<64x16xi32>
    %4 = arith.extui %3 : vector<64x16xi1> to vector<64x16xi32>
    %5 = arith.sitofp %4 : vector<64x16xi32> to vector<64x16xf32>
    %6 = tpu.transpose %5, [1, 0] : vector<64x16xf32> -> vector<16x64xf32>
    %c0_1 = arith.constant 0 : index
    %c0_2 = arith.constant 0 : index
    %7 = vector.load %arg2[%c0_1, %c0_2] : memref<64x128xf32, #tpu.memory_space<vmem>>, vector<64x128xf32>
    %cst = arith.constant dense<0.000000e+00> : vector<16x128xf32>
    %8 = tpu.matmul %6, %7, %cst {dimension_numbers = #tpu.dot_dimension_numbers<[1], [0], [0], [1], [0, 0, 1, 1], [], []>} : vector<16x64xf32>, vector<64x128xf32>, vector<16x128xf32> -> vector<16x128xf32>
    %c0_3 = arith.constant 0 : index
    %c0_4 = arith.constant 0 : index
    %9 = vector.load %arg3[%c0_3, %c0_4] : memref<16x128xf32, #tpu.memory_space<vmem>>, vector<16x128xf32>
    tpu.vector_store %arg3[%c0_3, %c0_4], %8 {strides = array<i32>} : memref<16x128xf32, #tpu.memory_space<vmem>>, vector<16x128xf32>,
    return
  }
  func.func @transform_0(%arg0: i32) -> (i32, i32) {
    %c0_i32 = arith.constant 0 : i32
    %c0_i32_0 = arith.constant 0 : i32
    return %c0_i32, %arg0 : i32, i32
  }
  func.func @transform_1(%arg0: i32) -> (i32, i32) {
    %c0_i32 = arith.constant 0 : i32
    %c0_i32_0 = arith.constant 0 : i32
    %c0_i32_1 = arith.constant 0 : i32
    return %c0_i32, %c0_i32_0 : i32, i32
  }
  func.func @transform_2(%arg0: i32) -> (i32, i32) {
    %c0_i32 = arith.constant 0 : i32
    %c0_i32_0 = arith.constant 0 : i32
    return %arg0, %c0_i32 : i32, i32
  }
}

module attributes {stable_mosaic.version = 11 : i64} {
  func.func @kernel(%arg0: i32, %arg1: memref<1x16xi32, #tpu.memory_space<vmem>>, %arg2: memref<64x128xf32, #tpu.memory_space<vmem>>, %arg3: memref<16x128xf32, #tpu.memory_space<vmem>>) attributes {dimension_semantics = [#tpu.dimension_semantics<parallel>], iteration_bounds = array<i64: 1>, scalar_prefetch = 0 : i64, scratch_operands = 0 : i64, tpu.core_type = #tpu.core_type<tc>, window_params = [{transform_indices = @transform_0, window_bounds = array<i64: 1, 16>}, {pipeline_mode = #tpu.pipeline_mode<synchronous>, transform_indices = @transform_1, window_bounds = array<i64: 64, 128>}, {transform_indices = @transform_2, window_bounds = array<i64: 16, 128>}]} {
    %c0 = arith.constant 0 : index
    %c0_0 = arith.constant 0 : index
    %0 = vector.load %arg1[%c0, %c0_0] : memref<1x16xi32, #tpu.memory_space<vmem>>, vector<1x16xi32>
    %1 = tpu.iota {dimensions = array<i32: 0>} : vector<64x16xi32>
    %2 = vector.broadcast %0 : vector<1x16xi32> to vector<64x16xi32>
    %3 = arith.cmpi eq, %1, %2 : vector<64x16xi32>
    %4 = arith.extui %3 : vector<64x16xi1> to vector<64x16xi32>
    %5 = arith.sitofp %4 : vector<64x16xi32> to vector<64x16xf32>
    %6 = tpu.transpose %5, [1, 0] : vector<64x16xf32> -> vector<16x64xf32>
    %c0_1 = arith.constant 0 : index
    %c0_2 = arith.constant 0 : index
    %7 = vector.load %arg2[%c0_1, %c0_2] : memref<64x128xf32, #tpu.memory_space<vmem>>, vector<64x128xf32>
    %cst = arith.constant dense<0.000000e+00> : vector<16x128xf32>
    %8 = tpu.matmul %6, %7, %cst {dimension_numbers = #tpu.dot_dimension_numbers<[1], [0], [0], [1], [0, 0, 1, 1], [], []>} : vector<16x64xf32>, vector<64x128xf32>, vector<16x128xf32> -> vector<16x128xf32>
    %c0_3 = arith.constant 0 : index
    %c0_4 = arith.constant 0 : index
    %9 = vector.load %arg3[%c0_3, %c0_4] : memref<16x128xf32, #tpu.memory_space<vmem>>, vector<16x128xf32>
    tpu.vector_store %arg3[%c0_3, %c0_4], %8 {strides = array<i32>} : memref<16x128xf32, #tpu.memory_space<vmem>>, vector<16x128xf32>,
    return
  }
  func.func @transform_0(%arg0: i32) -> (i32, i32) {
    %c0_i32 = arith.constant 0 : i32
    %c0_i32_0 = arith.constant 0 : i32
    return %c0_i32, %arg0 : i32, i32
  }
  func.func @transform_1(%arg0: i32) -> (i32, i32) {
    %c0_i32 = arith.constant 0 : i32
    %c0_i32_0 = arith.constant 0 : i32
    %c0_i32_1 = arith.constant 0 : i32
    return %c0_i32, %c0_i32_0 : i32, i32
  }
  func.func @transform_2(%arg0: i32) -> (i32, i32) {
    %c0_i32 = arith.constant 0 : i32
    %c0_i32_0 = arith.constant 0 : i32
    return %arg0, %c0_i32 : i32, i32
  }
}

</mosaic_0001>

<bundles_post_ra>
// kernel: tpu_custom_call.1
= control target key start
LH: loop header
LB: loop body
LE: loop exit
PB: predicated region body
PF: predicated region fallthrough
CT: control target
= control target key end

     0   :  { %7 = vsyncpa [#allocation3], 0  ;;  %s366_s0 = inlined_call_operand.hbm [shape: s32[1,16], index: 0, kind: input, shape index: {}]   ;;  %s367_s1 = inlined_call_operand.hbm [shape: f32[64,128], index: 1, kind: input, shape index: {}]   ;;  %s368_s2 = inlined_call_operand.hbm [shape: f32[16,128], index: 2, kind: output, shape index: {}]  }
   0x1   :  { %8 = vsyncpa [#allocation6], 0 }
   0x2   :  { %9 = vsyncpa [#allocation4], 0  ;;  %s330_s9 = smov [#allocation2]   ;;  %s331_s11 = smov [#allocation5]  }
   0x3   :  { %s16_s10 = sshll.u32 %s330_s9, 4  ;;  %s25_s12 = sshll.u32 %s331_s11, 4  ;;  %s17_s10 = int_to_ptr.vmem [resolvable:$true] %s16_s10  ;;  %s26_s12 = int_to_ptr.vmem [resolvable:$true] %s25_s12 }
   0x4   :  { %s272_s13 = scalar_lea.vmem %s17_s10, 16  ;;  %s276_s14 = scalar_lea.vmem %s17_s10, 32 }
   0x5   :  { %p273_p0 = scmp.ne.s32.totalorder %s17_s10, %s272_s13  ;;  %p277_p1 = scmp.lt.s32.totalorder %s17_s10, %s17_s10 }
   0x6   :  { %p278_p2 = scmp.lt.s32.totalorder %s276_s14, %s272_s13 }
   0x8   :  { %p279_p3 = por %p278_p2, %p277_p1 }
   0xa   :  { %p280_p4 = pnand %p279_p3, %p273_p0 }
   0xc   :  { %283 = shalt.err (!%p280_p4)
}
   0xd   :  { %19 = dma.hbm_to_vmem [thread:$0]  %s366_s0, 16, %s17_s10, [#allocation3]  }
   0xe   :  { %s292_s17 = scalar_lea.vmem %s26_s12, 1024  ;;  %p297_p6 = scmp.lt.s32.totalorder %s26_s12, %s26_s12 }
   0xf   :  { %p293_p5 = scmp.ne.s32.totalorder %s26_s12, %s292_s17  ;;  %p298_p7 = scmp.lt.s32.totalorder %s292_s17, %s292_s17 }
  0x11   :  { %p299_p8 = por %p298_p7, %p297_p6 }
  0x13   :  { %p300_p9 = pnand %p299_p8, %p293_p5 }
  0x15   :  { %303 = shalt.err (!%p300_p9)
}
  0x16   :  { %s332_s18 = smov 128   ;;  %s333_s19 = smov 8  }
  0x17   :  { %31 = dma.hbm_to_vmem [thread:$0]  %s367_s1, 1024, %s26_s12, [#allocation6], %s332_s18, %s332_s18, %s333_s19  }
  0x18   :  { %324 = dma.done.wait [#allocation3], 16  }
  0x19   :  { %325 = vsyncadd [#allocation3], 4294967280 }
  0x1a   :  { %326 = dma.done.wait [#allocation6], 1024  }
  0x1b   :  { %327 = vsyncadd [#allocation6], 4294966272  ;;  %v39_v0 = vlaneseq  ;;  %v218_v3 = vld [vmem:[#allocation2] ss:$0 sm:$0xff]  ;;  %v114_v6 = vld [vmem:[#allocation5 + $0x30] sm:$0xff]  ;;  %v334_v7 = vmov 0.0  }
  0x1c   :  { %v115_v4 = vld [vmem:[#allocation5 + $0x38] sm:$0xff]  ;;  %v113_v9 = vld [vmem:[#allocation5 + $0x28] sm:$0xff]  ;;  %v112_v12 = vld [vmem:[#allocation5 + $0x20] sm:$0xff]  ;;  %vm116_vm8 = vcmask 523264   ;;  %s335_s0 = smov [#allocation7]  }
  0x1d   :  { %v40_v1 = vshrl.u32 %v39_v0, 7  ;;  %239 = vmatprep.subr.mxu0 %v115_v4  ;;  %v111_v13 = vld [vmem:[#allocation5 + $0x18] sm:$0xff]  ;;  %v110_v16 = vld [vmem:[#allocation5 + $0x10] sm:$0xff]  ;;  %v109_v17 = vld [vmem:[#allocation5 + $0x8] sm:$0xff]  ;;  %s205_s1 = sshll.u32 %s335_s0, 4  ;;  %s206_s1 = int_to_ptr.vmem [resolvable:$true] %s205_s1 }
  0x1e   :  { %240 = vmatpush3.msra.mxu0 %v115_v4  ;;  %v108_v20 = vld [vmem:[#allocation5] sm:$0xff]  ;;  %s304_s22 = scalar_lea.vmem %s206_s1, 256  ;;  %p309_p11 = scmp.lt.s32.totalorder %s206_s1, %s206_s1 }
  0x1f   :  { %v41_v2 = vadd.s32 8, %v40_v1  ;;  %vm52_vm0 = vcmp.eq.s32.totalorder %v40_v1, %v218_v3  ;;  %v42_v5 = vadd.s32 16, %v40_v1  ;;  %241 = vmatprep.subr.mxu0 %v114_v6  ;;  %v43_v11 = vadd.s32 24, %v40_v1  ;;  %p305_p10 = scmp.ne.s32.totalorder %s206_s1, %s304_s22  ;;  %p310_p12 = scmp.lt.s32.totalorder %s304_s22, %s304_s22 }
  0x20   :  { %v219_v8 = vsel %vm52_vm0, 1.0, %v334_v7  ;;  %242 = vmatpush3.msra.mxu0 %v114_v6  ;;  %v44_v15 = vadd.s32 32, %v40_v1  ;;  %v45_v19 = vadd.s32 40, %v40_v1  ;;  %v46_v22 = vadd.s32 48, %v40_v1 }
  0x21   :  { %vm53_vm1 = vcmp.eq.s32.totalorder %v41_v2, %v218_v3  ;;  %76 = vxpose.xlu0.b32.start [1/8] (short) (narrow) %v219_v8, 16  ;;  %vm54_vm2 = vcmp.eq.s32.totalorder %v42_v5, %v218_v3  ;;  %243 = vmatprep.subr.mxu0 %v113_v9  ;;  %vm55_vm3 = vcmp.eq.s32.totalorder %v43_v11, %v218_v3  ;;  %v47_v24 = vadd.s32 56, %v40_v1  ;;  %p311_p13 = por %p310_p12, %p309_p11 }
  0x22   :  { %v220_v10 = vsel %vm53_vm1, 1.0, %v334_v7  ;;  %244 = vmatpush3.msra.mxu0 %v113_v9  ;;  %v221_v14 = vsel %vm54_vm2, 1.0, %v334_v7  ;;  %v222_v18 = vsel %vm55_vm3, 1.0, %v334_v7  ;;  %vm56_vm4 = vcmp.eq.s32.totalorder %v44_v15, %v218_v3 }
  0x23   :  { %245 = vmatprep.subr.mxu0 %v112_v12  ;;  %v223_v21 = vsel %vm56_vm4, 1.0, %v334_v7  ;;  %vm57_vm5 = vcmp.eq.s32.totalorder %v45_v19, %v218_v3  ;;  %vm58_vm6 = vcmp.eq.s32.totalorder %v46_v22, %v218_v3  ;;  %vm59_vm7 = vcmp.eq.s32.totalorder %v47_v24, %v218_v3  ;;  %p312_p0 = pnand %p311_p13, %p305_p10 }
  0x24   :  { %246 = vmatpush3.msra.mxu0 %v112_v12  ;;  %v224_v23 = vsel %vm57_vm5, 1.0, %v334_v7  ;;  %v225_v25 = vsel %vm58_vm6, 1.0, %v334_v7  ;;  %v226_v26 = vsel %vm59_vm7, 1.0, %v334_v7 }
  0x25   :  { %77 = vxpose.xlu0.b32.cont [2/8] (short) (narrow) %v220_v10, 16  ;;  %247 = vmatprep.subr.mxu0 %v111_v13 }
  0x26   :  { %248 = vmatpush3.msra.mxu0 %v111_v13 }
  0x27   :  { %249 = vmatprep.subr.mxu0 %v110_v16 }
  0x28   :  { %250 = vmatpush3.msra.mxu0 %v110_v16 }
  0x29   :  { %78 = vxpose.xlu0.b32.cont [3/8] (short) (narrow) %v221_v14, 16  ;;  %251 = vmatprep.subr.mxu0 %v109_v17 }
  0x2a   :  { %252 = vmatpush3.msra.mxu0 %v109_v17 }
  0x2b   :  { %253 = vmatprep.subr.mxu0 %v108_v20 }
  0x2c   :  { %254 = vmatpush3.msra.mxu0 %v108_v20 }
  0x2d   :  { %79 = vxpose.xlu0.b32.cont [4/8] (short) (narrow) %v222_v18, 16 }
  0x31   :  { %80 = vxpose.xlu0.b32.cont [5/8] (short) (narrow) %v223_v21, 16 }
  0x35   :  { %81 = vxpose.xlu0.b32.cont [6/8] (short) (narrow) %v224_v23, 16 }
  0x39   :  { %82 = vxpose.xlu0.b32.cont [7/8] (short) (narrow) %v225_v25, 16 }
  0x3d   :  { %83 = vxpose.xlu0.b32.end [8/8] (short) (narrow) %v226_v26, 16 }
  0x9d   :  { %v92_v27 = vpop.trf.xlu0 }
  0x9e   :  { %255 = vmatprep.mubr.msk.f32.mxu0 %vm116_vm8, %v92_v27 }
  0xa1   :  { %v93_v28 = vpop.trf.xlu0 }
  0xa2   :  { %256 = vmatmul.mubr.msk.f32.vlgmr.msra.gmra.mxu0 %vm116_vm8, %v93_v28 }
 0x162   :  { %v257_v29 = vpop.f32.mrf.mxu0 }
 0x163   :  { %199 = vst [vmem:[#allocation7 + $0x8] sm:$0xff] %v257_v29 }
 0x164   :  { %v189_v30 = vpop.f32.mrf.mxu0 }
 0x165   :  { %198 = vst [vmem:[#allocation7] sm:$0xff] %v189_v30 }
 0x166   :  { %315 = shalt.err (!%p312_p0)
}
 0x167   :  { %211 = dma.vmem_to_hbm [thread:$0]  %s206_s1, 256, %s368_s2, [#allocation4], %s332_s18, %s332_s18, %s333_s19  }
 0x168   :  { %328 = dma.done.wait [#allocation4], 256  }
 0x169   :  { %329 = vsyncadd [#allocation4], 4294967040 }
 0x16a   :  { %215 = vsyncpa [#allocation3], 1 }
 0x16b   :  { %216 = vsyncpa [#allocation6], 1 }
 0x16c   :  { %217 = vsyncpa [#allocation4], 1 }

// kernel: tpu_custom_call.1
= control target key start
LH: loop header
LB: loop body
LE: loop exit
PB: predicated region body
PF: predicated region fallthrough
CT: control target
= control target key end

     0   :  { %7 = vsyncpa [#allocation3], 0  ;;  %s366_s0 = inlined_call_operand.hbm [shape: s32[1,16], index: 0, kind: input, shape index: {}]   ;;  %s367_s1 = inlined_call_operand.hbm [shape: f32[64,128], index: 1, kind: input, shape index: {}]   ;;  %s368_s2 = inlined_call_operand.hbm [shape: f32[16,128], index: 2, kind: output, shape index: {}]  }
   0x1   :  { %8 = vsyncpa [#allocation6], 0 }
   0x2   :  { %9 = vsyncpa [#allocation4], 0  ;;  %s330_s9 = smov [#allocation2]   ;;  %s331_s11 = smov [#allocation5]  }
   0x3   :  { %s16_s10 = sshll.u32 %s330_s9, 4  ;;  %s25_s12 = sshll.u32 %s331_s11, 4  ;;  %s17_s10 = int_to_ptr.vmem [resolvable:$true] %s16_s10  ;;  %s26_s12 = int_to_ptr.vmem [resolvable:$true] %s25_s12 }
   0x4   :  { %s272_s13 = scalar_lea.vmem %s17_s10, 16  ;;  %s276_s14 = scalar_lea.vmem %s17_s10, 32 }
   0x5   :  { %p273_p0 = scmp.ne.s32.totalorder %s17_s10, %s272_s13  ;;  %p277_p1 = scmp.lt.s32.totalorder %s17_s10, %s17_s10 }
   0x6   :  { %p278_p2 = scmp.lt.s32.totalorder %s276_s14, %s272_s13 }
   0x8   :  { %p279_p3 = por %p278_p2, %p277_p1 }
   0xa   :  { %p280_p4 = pnand %p279_p3, %p273_p0 }
   0xc   :  { %283 = shalt.err (!%p280_p4)
}
   0xd   :  { %19 = dma.hbm_to_vmem [thread:$0]  %s366_s0, 16, %s17_s10, [#allocation3]  }
   0xe   :  { %s292_s17 = scalar_lea.vmem %s26_s12, 1024  ;;  %p297_p6 = scmp.lt.s32.totalorder %s26_s12, %s26_s12 }
   0xf   :  { %p293_p5 = scmp.ne.s32.totalorder %s26_s12, %s292_s17  ;;  %p298_p7 = scmp.lt.s32.totalorder %s292_s17, %s292_s17 }
  0x11   :  { %p299_p8 = por %p298_p7, %p297_p6 }
  0x13   :  { %p300_p9 = pnand %p299_p8, %p293_p5 }
  0x15   :  { %303 = shalt.err (!%p300_p9)
}
  0x16   :  { %s332_s18 = smov 128   ;;  %s333_s19 = smov 8  }
  0x17   :  { %31 = dma.hbm_to_vmem [thread:$0]  %s367_s1, 1024, %s26_s12, [#allocation6], %s332_s18, %s332_s18, %s333_s19  }
  0x18   :  { %324 = dma.done.wait [#allocation3], 16  }
  0x19   :  { %325 = vsyncadd [#allocation3], 4294967280 }
  0x1a   :  { %326 = dma.done.wait [#allocation6], 1024  }
  0x1b   :  { %327 = vsyncadd [#allocation6], 4294966272  ;;  %v39_v0 = vlaneseq  ;;  %v218_v3 = vld [vmem:[#allocation2] ss:$0 sm:$0xff]  ;;  %v114_v6 = vld [vmem:[#allocation5 + $0x30] sm:$0xff]  ;;  %v334_v7 = vmov 0.0  }
  0x1c   :  { %v115_v4 = vld [vmem:[#allocation5 + $0x38] sm:$0xff]  ;;  %v113_v9 = vld [vmem:[#allocation5 + $0x28] sm:$0xff]  ;;  %v112_v12 = vld [vmem:[#allocation5 + $0x20] sm:$0xff]  ;;  %vm116_vm8 = vcmask 523264   ;;  %s335_s0 = smov [#allocation7]  }
  0x1d   :  { %v40_v1 = vshrl.u32 %v39_v0, 7  ;;  %239 = vmatprep.subr.mxu0 %v115_v4  ;;  %v111_v13 = vld [vmem:[#allocation5 + $0x18] sm:$0xff]  ;;  %v110_v16 = vld [vmem:[#allocation5 + $0x10] sm:$0xff]  ;;  %v109_v17 = vld [vmem:[#allocation5 + $0x8] sm:$0xff]  ;;  %s205_s1 = sshll.u32 %s335_s0, 4  ;;  %s206_s1 = int_to_ptr.vmem [resolvable:$true] %s205_s1 }
  0x1e   :  { %240 = vmatpush3.msra.mxu0 %v115_v4  ;;  %v108_v20 = vld [vmem:[#allocation5] sm:$0xff]  ;;  %s304_s22 = scalar_lea.vmem %s206_s1, 256  ;;  %p309_p11 = scmp.lt.s32.totalorder %s206_s1, %s206_s1 }
  0x1f   :  { %v41_v2 = vadd.s32 8, %v40_v1  ;;  %vm52_vm0 = vcmp.eq.s32.totalorder %v40_v1, %v218_v3  ;;  %v42_v5 = vadd.s32 16, %v40_v1  ;;  %241 = vmatprep.subr.mxu0 %v114_v6  ;;  %v43_v11 = vadd.s32 24, %v40_v1  ;;  %p305_p10 = scmp.ne.s32.totalorder %s206_s1, %s304_s22  ;;  %p310_p12 = scmp.lt.s32.totalorder %s304_s22, %s304_s22 }
  0x20   :  { %v219_v8 = vsel %vm52_vm0, 1.0, %v334_v7  ;;  %242 = vmatpush3.msra.mxu0 %v114_v6  ;;  %v44_v15 = vadd.s32 32, %v40_v1  ;;  %v45_v19 = vadd.s32 40, %v40_v1  ;;  %v46_v22 = vadd.s32 48, %v40_v1 }
  0x21   :  { %vm53_vm1 = vcmp.eq.s32.totalorder %v41_v2, %v218_v3  ;;  %76 = vxpose.xlu0.b32.start [1/8] (short) (narrow) %v219_v8, 16  ;;  %vm54_vm2 = vcmp.eq.s32.totalorder %v42_v5, %v218_v3  ;;  %243 = vmatprep.subr.mxu0 %v113_v9  ;;  %vm55_vm3 = vcmp.eq.s32.totalorder %v43_v11, %v218_v3  ;;  %v47_v24 = vadd.s32 56, %v40_v1  ;;  %p311_p13 = por %p310_p12, %p309_p11 }
  0x22   :  { %v220_v10 = vsel %vm53_vm1, 1.0, %v334_v7  ;;  %244 = vmatpush3.msra.mxu0 %v113_v9  ;;  %v221_v14 = vsel %vm54_vm2, 1.0, %v334_v7  ;;  %v222_v18 = vsel %vm55_vm3, 1.0, %v334_v7  ;;  %vm56_vm4 = vcmp.eq.s32.totalorder %v44_v15, %v218_v3 }
  0x23   :  { %245 = vmatprep.subr.mxu0 %v112_v12  ;;  %v223_v21 = vsel %vm56_vm4, 1.0, %v334_v7  ;;  %vm57_vm5 = vcmp.eq.s32.totalorder %v45_v19, %v218_v3  ;;  %vm58_vm6 = vcmp.eq.s32.totalorder %v46_v22, %v218_v3  ;;  %vm59_vm7 = vcmp.eq.s32.totalorder %v47_v24, %v218_v3  ;;  %p312_p0 = pnand %p311_p13, %p305_p10 }
  0x24   :  { %246 = vmatpush3.msra.mxu0 %v112_v12  ;;  %v224_v23 = vsel %vm57_vm5, 1.0, %v334_v7  ;;  %v225_v25 = vsel %vm58_vm6, 1.0, %v334_v7  ;;  %v226_v26 = vsel %vm59_vm7, 1.0, %v334_v7 }
  0x25   :  { %77 = vxpose.xlu0.b32.cont [2/8] (short) (narrow) %v220_v10, 16  ;;  %247 = vmatprep.subr.mxu0 %v111_v13 }
  0x26   :  { %248 = vmatpush3.msra.mxu0 %v111_v13 }
  0x27   :  { %249 = vmatprep.subr.mxu0 %v110_v16 }
  0x28   :  { %250 = vmatpush3.msra.mxu0 %v110_v16 }
  0x29   :  { %78 = vxpose.xlu0.b32.cont [3/8] (short) (narrow) %v221_v14, 16  ;;  %251 = vmatprep.subr.mxu0 %v109_v17 }
  0x2a   :  { %252 = vmatpush3.msra.mxu0 %v109_v17 }
  0x2b   :  { %253 = vmatprep.subr.mxu0 %v108_v20 }
  0x2c   :  { %254 = vmatpush3.msra.mxu0 %v108_v20 }
  0x2d   :  { %79 = vxpose.xlu0.b32.cont [4/8] (short) (narrow) %v222_v18, 16 }
  0x31   :  { %80 = vxpose.xlu0.b32.cont [5/8] (short) (narrow) %v223_v21, 16 }
  0x35   :  { %81 = vxpose.xlu0.b32.cont [6/8] (short) (narrow) %v224_v23, 16 }
  0x39   :  { %82 = vxpose.xlu0.b32.cont [7/8] (short) (narrow) %v225_v25, 16 }
  0x3d   :  { %83 = vxpose.xlu0.b32.end [8/8] (short) (narrow) %v226_v26, 16 }
  0x9d   :  { %v92_v27 = vpop.trf.xlu0 }
  0x9e   :  { %255 = vmatprep.mubr.msk.f32.mxu0 %vm116_vm8, %v92_v27 }
  0xa1   :  { %v93_v28 = vpop.trf.xlu0 }
  0xa2   :  { %256 = vmatmul.mubr.msk.f32.vlgmr.msra.gmra.mxu0 %vm116_vm8, %v93_v28 }
 0x162   :  { %v257_v29 = vpop.f32.mrf.mxu0 }
 0x163   :  { %199 = vst [vmem:[#allocation7 + $0x8] sm:$0xff] %v257_v29 }
 0x164   :  { %v189_v30 = vpop.f32.mrf.mxu0 }
 0x165   :  { %198 = vst [vmem:[#allocation7] sm:$0xff] %v189_v30 }
 0x166   :  { %315 = shalt.err (!%p312_p0)
}
 0x167   :  { %211 = dma.vmem_to_hbm [thread:$0]  %s206_s1, 256, %s368_s2, [#allocation4], %s332_s18, %s332_s18, %s333_s19  }
 0x168   :  { %328 = dma.done.wait [#allocation4], 256  }
 0x169   :  { %329 = vsyncadd [#allocation4], 4294967040 }
 0x16a   :  { %215 = vsyncpa [#allocation3], 1 }
 0x16b   :  { %216 = vsyncpa [#allocation6], 1 }
 0x16c   :  { %217 = vsyncpa [#allocation4], 1 }

</bundles_post_ra>
